<compile_context>
chip_gen: v5e
topology: v5e:2x2
jax: 0.10.0
libtpu: 0.0.40
codegen_flags: <defaults>
</compile_context>

<pallas_src>
import functools

import jax
import jax.numpy as jnp
from jax.experimental import pallas as pl
from jax.experimental.pallas import tpu as pltpu


def res2d_kernel(masks_ref, x_ref, w1_ref, w2_ref, out_ref, slab_ref, *, H, W):
    Cin, M = x_ref.shape
    Cout = out_ref.shape[0]
    K1 = 9 * Cin + 1             # taps of x + ones row (bias)
    K2 = 9 * Cout + Cin + 1      # taps of h1 + x rows (1x1 skip) + ones row (biases)
    dims = (((1,), (0,)), ((), ()))
    ones_row = jnp.ones((1, M), jnp.float32)

    x = x_ref[...]               # (Cin, M) f32, lane dim = flattened H*W

    def fill_taps(src, C):
        # rows [t*C:(t+1)*C] of the shared slab = src rolled by tap t, boundary-masked.
        for t in range(9):
            dy, dx = t // 3, t % 3
            off = (dy - 1) * W + (dx - 1)        # source = q + off (when in-bounds)
            tap = src if off == 0 else pltpu.roll(src, shift=(-off) % M, axis=1)
            if t != 4:                           # center tap needs no mask
                midx = t if t < 4 else t - 1
                tap = tap * masks_ref[midx:midx + 1, :]
            slab_ref[t * C:(t + 1) * C, :] = tap

    # ---- conv1 (3x3, pad=1, BN + bias folded into weight columns) + ReLU ----
    fill_taps(x, Cin)
    slab_ref[K1 - 1:K1, :] = ones_row
    h1 = jnp.maximum(
        jax.lax.dot_general(w1_ref[...], slab_ref[0:K1, :].astype(jnp.bfloat16),
                            dims, preferred_element_type=jnp.float32),
        0.0)                                     # (Cout, M) f32

    # ---- conv2 + 1x1 skip + (b2 + b_skip), all in ONE contraction, then ReLU ----
    fill_taps(h1, Cout)
    slab_ref[9 * Cout:9 * Cout + Cin, :] = x
    slab_ref[K2 - 1:K2, :] = ones_row
    out_ref[...] = jnp.maximum(
        jax.lax.dot_general(w2_ref[...], slab_ref[0:K2, :].astype(jnp.bfloat16),
                            dims, preferred_element_type=jnp.float32),
        0.0)                                     # lane-dense (Cout, H*W) store


def res2d_block_nchw(x_nchw, w1_ext, w2_ext, masks):
    """x_nchw: (N, Cin, H, W) f32.  w1_ext: (Cout, 9*Cin+1) bf16.
    w2_ext: (Cout, 9*Cout+Cin+1) bf16.  masks: (8, H*W) f32.  Returns (N, Cout, H, W)."""
    N, Cin, H, W = x_nchw.shape
    Cout = w1_ext.shape[0]
    M = H * W
    K1 = 9 * Cin + 1
    K2 = 9 * Cout + Cin + 1
    Kmax = max(K1, K2)
    x_flat = x_nchw.reshape(N, Cin, M)           # free trailing-dim collapse

    out_flat = pl.pallas_call(
        functools.partial(res2d_kernel, H=H, W=W),
        out_shape=jax.ShapeDtypeStruct((N, Cout, M), jnp.float32),
        grid=(N,),
        in_specs=[
            pl.BlockSpec((8, M), lambda n: (0, 0)),           # masks (VMEM-resident)
            pl.BlockSpec((None, Cin, M), lambda n: (n, 0, 0)),
            pl.BlockSpec((Cout, K1), lambda n: (0, 0)),        # w1 (+bias col), bf16
            pl.BlockSpec((Cout, K2), lambda n: (0, 0)),        # w2|skip|bias, bf16
        ],
        out_specs=pl.BlockSpec((None, Cout, M), lambda n: (n, 0, 0)),
        scratch_shapes=[pltpu.VMEM((Kmax, M), jnp.float32)],   # shared im2col slab
        compiler_params=pltpu.CompilerParams(dimension_semantics=("parallel",)),
    )(masks, x_flat, w1_ext, w2_ext)

    return out_flat.reshape(N, Cout, H, W)       # free reshape back to NCHW


def make_boundary_masks(H, W):
    """(8, H*W) f32 masks for the 8 non-center 3x3 taps (order: taps 0..8 minus 4)."""
    pos = jnp.arange(H * W, dtype=jnp.int32)
    row, col = pos // W, pos % W
    rows = []
    for t in range(9):
        if t == 4:
            continue
        dy, dx = t // 3, t % 3
        ok = jnp.ones((H * W,), dtype=jnp.bool_)
        if dy == 0:
            ok = ok & (row >= 1)
        elif dy == 2:
            ok = ok & (row <= H - 2)
        if dx == 0:
            ok = ok & (col >= 1)
        elif dx == 2:
            ok = ok & (col <= W - 2)
        rows.append(ok.astype(jnp.float32))
    return jnp.stack(rows, axis=0)


def fold_bn(w_oihw, conv_b, gamma, beta, mean, var, eps=1e-5):
    scale = gamma / jnp.sqrt(var + eps)
    w_f = w_oihw * scale[:, None, None, None]
    b_f = (conv_b - mean) * scale + beta
    return w_f, b_f


def pack_weights(w1f, b1f, w2f, b2f, wsf, bsf):
    """Fold taps + biases + skip into the two extended bf16 weight matrices."""
    Cout, Cin = w1f.shape[0], w1f.shape[1]
    w1_big = jnp.transpose(w1f, (0, 2, 3, 1)).reshape(Cout, 9 * Cin)    # row = t*Cin+c
    w2_big = jnp.transpose(w2f, (0, 2, 3, 1)).reshape(Cout, 9 * Cout)
    ws_mat = wsf[:, :, 0, 0]                                            # (Cout, Cin)
    w1_ext = jnp.concatenate([w1_big, b1f[:, None]], axis=1).astype(jnp.bfloat16)
    w2_ext = jnp.concatenate([w2_big, ws_mat, (b2f + bsf)[:, None]],
                             axis=1).astype(jnp.bfloat16)
    return w1_ext, w2_ext


def ref_forward_nchw(x, w1f, b1f, w2f, b2f, wsf, bsf):
    dn = ('NCHW', 'OIHW', 'NCHW')
    y1 = jax.lax.conv_general_dilated(x, w1f, (1, 1), [(1, 1), (1, 1)],
                                      dimension_numbers=dn) + b1f[None, :, None, None]
    h1 = jnp.maximum(y1, 0.0)
    y2 = jax.lax.conv_general_dilated(h1, w2f, (1, 1), [(1, 1), (1, 1)],
                                      dimension_numbers=dn) + b2f[None, :, None, None]
    sk = jax.lax.conv_general_dilated(x, wsf, (1, 1), [(0, 0), (0, 0)],
                                      dimension_numbers=dn) + bsf[None, :, None, None]
    return jnp.maximum(y2 + sk, 0.0)


if __name__ == "__main__":
    N, Cin, Cout, H, W = 2, 4, 8, 16, 16   # in_planes != out_planes -> 1x1-conv skip
    ks = jax.random.split(jax.random.PRNGKey(0), 20)

    # Conv / BN parameters (deterministic, PyTorch shapes: OIHW conv weights).
    w1 = 0.1 * jax.random.normal(ks[0], (Cout, Cin, 3, 3), jnp.float32)
    cb1 = 0.1 * jax.random.normal(ks[1], (Cout,), jnp.float32)
    g1 = 1.0 + 0.1 * jax.random.normal(ks[2], (Cout,), jnp.float32)
    be1 = 0.1 * jax.random.normal(ks[3], (Cout,), jnp.float32)
    m1 = 0.1 * jax.random.normal(ks[4], (Cout,), jnp.float32)
    v1 = jnp.abs(jax.random.normal(ks[5], (Cout,), jnp.float32)) + 0.5

    w2 = 0.1 * jax.random.normal(ks[6], (Cout, Cout, 3, 3), jnp.float32)
    cb2 = 0.1 * jax.random.normal(ks[7], (Cout,), jnp.float32)
    g2 = 1.0 + 0.1 * jax.random.normal(ks[8], (Cout,), jnp.float32)
    be2 = 0.1 * jax.random.normal(ks[9], (Cout,), jnp.float32)
    m2 = 0.1 * jax.random.normal(ks[10], (Cout,), jnp.float32)
    v2 = jnp.abs(jax.random.normal(ks[11], (Cout,), jnp.float32)) + 0.5

    wsk = 0.1 * jax.random.normal(ks[12], (Cout, Cin, 1, 1), jnp.float32)
    cbs = 0.1 * jax.random.normal(ks[13], (Cout,), jnp.float32)
    gs = 1.0 + 0.1 * jax.random.normal(ks[14], (Cout,), jnp.float32)
    bes = 0.1 * jax.random.normal(ks[15], (Cout,), jnp.float32)
    ms = 0.1 * jax.random.normal(ks[16], (Cout,), jnp.float32)
    vs = jnp.abs(jax.random.normal(ks[17], (Cout,), jnp.float32)) + 0.5

    # Fold BN (eval mode) into conv weights / biases, then pack for the kernel.
    w1f, b1f = fold_bn(w1, cb1, g1, be1, m1, v1)
    w2f, b2f = fold_bn(w2, cb2, g2, be2, m2, v2)
    wsf, bsf = fold_bn(wsk, cbs, gs, bes, ms, vs)
    w1_ext, w2_ext = pack_weights(w1f, b1f, w2f, b2f, wsf, bsf)
    masks = make_boundary_masks(H, W)

    x = jax.random.normal(ks[18], (N, Cin, H, W), jnp.float32)

    out = res2d_block_nchw(x, w1_ext, w2_ext, masks)
    out = jax.block_until_ready(out)

    ref = ref_forward_nchw(x, w1f, b1f, w2f, b2f, wsf, bsf)
    assert out.shape == (N, Cout, H, W)
    # bf16 MXU operands (f32 accumulate) -> loosened tolerance vs the f32 reference.
    max_err = float(jnp.max(jnp.abs(out - ref)))
    assert jnp.allclose(out, ref, rtol=5e-2, atol=5e-2), max_err

    print("KERNEL_OK")
</pallas_src>

<mosaic_0001>
module attributes {stable_mosaic.version = 11 : i64} {
  func.func @res2d_kernel(%arg0: i32, %arg1: memref<8x256xf32, #tpu.memory_space<vmem>>, %arg2: memref<1x4x256xf32, #tpu.memory_space<vmem>>, %arg3: memref<8x37xbf16, #tpu.memory_space<vmem>>, %arg4: memref<8x77xbf16, #tpu.memory_space<vmem>>, %arg5: memref<1x8x256xf32, #tpu.memory_space<vmem>>, %arg6: memref<77x256xf32, #tpu.memory_space<vmem>>) attributes {dimension_semantics = [#tpu.dimension_semantics<parallel>], iteration_bounds = array<i64: 2>, scalar_prefetch = 0 : i64, scratch_operands = 1 : i64, tpu.core_type = #tpu.core_type<tc>, window_params = [{pipeline_mode = #tpu.pipeline_mode<synchronous>, transform_indices = @transform_0, window_bounds = array<i64: 8, 256>}, {transform_indices = @transform_1, window_bounds = array<i64: 1, 4, 256>}, {pipeline_mode = #tpu.pipeline_mode<synchronous>, transform_indices = @transform_2, window_bounds = array<i64: 8, 37>}, {pipeline_mode = #tpu.pipeline_mode<synchronous>, transform_indices = @transform_3, window_bounds = array<i64: 8, 77>}, {transform_indices = @transform_4, window_bounds = array<i64: 1, 8, 256>}]} {
    %cst = arith.constant 1.000000e+00 : f32
    %0 = vector.broadcast %cst : f32 to vector<1x256xf32>
    %c0 = arith.constant 0 : index
    %c0_0 = arith.constant 0 : index
    %c0_1 = arith.constant 0 : index
    %1 = vector.load %arg2[%c0, %c0_0, %c0_1] : memref<1x4x256xf32, #tpu.memory_space<vmem>>, vector<1x4x256xf32>
    %2 = vector.shape_cast %1 : vector<1x4x256xf32> to vector<4x256xf32>
    %c17_i32 = arith.constant 17 : i32
    %3 = tpu.dynamic_rotate %2 by %c17_i32 dim 1 : vector<4x256xf32>, i32 -> vector<4x256xf32>
    %c0_2 = arith.constant 0 : index
    %c0_3 = arith.constant 0 : index
    %4 = vector.load %arg1[%c0_2, %c0_3] : memref<8x256xf32, #tpu.memory_space<vmem>>, vector<1x256xf32>
    %5 = vector.broadcast %4 : vector<1x256xf32> to vector<4x256xf32>
    %6 = arith.mulf %3, %5 : vector<4x256xf32>
    %c0_4 = arith.constant 0 : index
    %c0_5 = arith.constant 0 : index
    %7 = vector.load %arg6[%c0_4, %c0_5] : memref<77x256xf32, #tpu.memory_space<vmem>>, vector<4x256xf32>
    tpu.vector_store %arg6[%c0_4, %c0_5], %6 {strides = array<i32>} : memref<77x256xf32, #tpu.memory_space<vmem>>, vector<4x256xf32>,
    %c16_i32 = arith.constant 16 : i32
    %8 = tpu.dynamic_rotate %2 by %c16_i32 dim 1 : vector<4x256xf32>, i32 -> vector<4x256xf32>
    %c1 = arith.constant 1 : index
    %c0_6 = arith.constant 0 : index
    %9 = vector.load %arg1[%c1, %c0_6] : memref<8x256xf32, #tpu.memory_space<vmem>>, vector<1x256xf32>
    %10 = vector.broadcast %9 : vector<1x256xf32> to vector<4x256xf32>
    %11 = arith.mulf %8, %10 : vector<4x256xf32>
    %c4 = arith.constant 4 : index
    %c0_7 = arith.constant 0 : index
    %12 = vector.load %arg6[%c4, %c0_7] : memref<77x256xf32, #tpu.memory_space<vmem>>, vector<4x256xf32>
    tpu.vector_store %arg6[%c4, %c0_7], %11 {strides = array<i32>} : memref<77x256xf32, #tpu.memory_space<vmem>>, vector<4x256xf32>,
    %c15_i32 = arith.constant 15 : i32
    %13 = tpu.dynamic_rotate %2 by %c15_i32 dim 1 : vector<4x256xf32>, i32 -> vector<4x256xf32>
    %c2 = arith.constant 2 : index
    %c0_8 = arith.constant 0 : index
    %14 = vector.load %arg1[%c2, %c0_8] : memref<8x256xf32, #tpu.memory_space<vmem>>, vector<1x256xf32>
    %15 = vector.broadcast %14 : vector<1x256xf32> to vector<4x256xf32>
    %16 = arith.mulf %13, %15 : vector<4x256xf32>
    %c8 = arith.constant 8 : index
    %c0_9 = arith.constant 0 : index
    %17 = vector.load %arg6[%c8, %c0_9] : memref<77x256xf32, #tpu.memory_space<vmem>>, vector<4x256xf32>
    tpu.vector_store %arg6[%c8, %c0_9], %16 {strides = array<i32>} : memref<77x256xf32, #tpu.memory_space<vmem>>, vector<4x256xf32>,
    %c1_i32 = arith.constant 1 : i32
    %18 = tpu.dynamic_rotate %2 by %c1_i32 dim 1 : vector<4x256xf32>, i32 -> vector<4x256xf32>
    %c3 = arith.constant 3 : index
    %c0_10 = arith.constant 0 : index
    %19 = vector.load %arg1[%c3, %c0_10] : memref<8x256xf32, #tpu.memory_space<vmem>>, vector<1x256xf32>
    %20 = vector.broadcast %19 : vector<1x256xf32> to vector<4x256xf32>
    %21 = arith.mulf %18, %20 : vector<4x256xf32>
    %c12 = arith.constant 12 : index
    %c0_11 = arith.constant 0 : index
    %22 = vector.load %arg6[%c12, %c0_11] : memref<77x256xf32, #tpu.memory_space<vmem>>, vector<4x256xf32>
    tpu.vector_store %arg6[%c12, %c0_11], %21 {strides = array<i32>} : memref<77x256xf32, #tpu.memory_space<vmem>>, vector<4x256xf32>,
    %c16 = arith.constant 16 : index
    %c0_12 = arith.constant 0 : index
    %23 = vector.load %arg6[%c16, %c0_12] : memref<77x256xf32, #tpu.memory_space<vmem>>, vector<4x256xf32>
    tpu.vector_store %arg6[%c16, %c0_12], %2 {strides = array<i32>} : memref<77x256xf32, #tpu.memory_space<vmem>>, vector<4x256xf32>,
    %c255_i32 = arith.constant 255 : i32
    %24 = tpu.dynamic_rotate %2 by %c255_i32 dim 1 : vector<4x256xf32>, i32 -> vector<4x256xf32>
    %c4_13 = arith.constant 4 : index
    %c0_14 = arith.constant 0 : index
    %25 = vector.load %arg1[%c4_13, %c0_14] : memref<8x256xf32, #tpu.memory_space<vmem>>, vector<1x256xf32>
    %26 = vector.broadcast %25 : vector<1x256xf32> to vector<4x256xf32>
    %27 = arith.mulf %24, %26 : vector<4x256xf32>
    %c20 = arith.constant 20 : index
    %c0_15 = arith.constant 0 : index
    %28 = vector.load %arg6[%c20, %c0_15] : memref<77x256xf32, #tpu.memory_space<vmem>>, vector<4x256xf32>
    tpu.vector_store %arg6[%c20, %c0_15], %27 {strides = array<i32>} : memref<77x256xf32, #tpu.memory_space<vmem>>, vector<4x256xf32>,
    %c241_i32 = arith.constant 241 : i32
    %29 = tpu.dynamic_rotate %2 by %c241_i32 dim 1 : vector<4x256xf32>, i32 -> vector<4x256xf32>
    %c5 = arith.constant 5 : index
    %c0_16 = arith.constant 0 : index
    %30 = vector.load %arg1[%c5, %c0_16] : memref<8x256xf32, #tpu.memory_space<vmem>>, vector<1x256xf32>
    %31 = vector.broadcast %30 : vector<1x256xf32> to vector<4x256xf32>
    %32 = arith.mulf %29, %31 : vector<4x256xf32>
    %c24 = arith.constant 24 : index
    %c0_17 = arith.constant 0 : index
    %33 = vector.load %arg6[%c24, %c0_17] : memref<77x256xf32, #tpu.memory_space<vmem>>, vector<4x256xf32>
    tpu.vector_store %arg6[%c24, %c0_17], %32 {strides = array<i32>} : memref<77x256xf32, #tpu.memory_space<vmem>>, vector<4x256xf32>,
    %c240_i32 = arith.constant 240 : i32
    %34 = tpu.dynamic_rotate %2 by %c240_i32 dim 1 : vector<4x256xf32>, i32 -> vector<4x256xf32>
    %c6 = arith.constant 6 : index
    %c0_18 = arith.constant 0 : index
    %35 = vector.load %arg1[%c6, %c0_18] : memref<8x256xf32, #tpu.memory_space<vmem>>, vector<1x256xf32>
    %36 = vector.broadcast %35 : vector<1x256xf32> to vector<4x256xf32>
    %37 = arith.mulf %34, %36 : vector<4x256xf32>
    %c28 = arith.constant 28 : index
    %c0_19 = arith.constant 0 : index
    %38 = vector.load %arg6[%c28, %c0_19] : memref<77x256xf32, #tpu.memory_space<vmem>>, vector<4x256xf32>
    tpu.vector_store %arg6[%c28, %c0_19], %37 {strides = array<i32>} : memref<77x256xf32, #tpu.memory_space<vmem>>, vector<4x256xf32>,
    %c239_i32 = arith.constant 239 : i32
    %39 = tpu.dynamic_rotate %2 by %c239_i32 dim 1 : vector<4x256xf32>, i32 -> vector<4x256xf32>
    %c7 = arith.constant 7 : index
    %c0_20 = arith.constant 0 : index
    %40 = vector.load %arg1[%c7, %c0_20] : memref<8x256xf32, #tpu.memory_space<vmem>>, vector<1x256xf32>
    %41 = vector.broadcast %40 : vector<1x256xf32> to vector<4x256xf32>
    %42 = arith.mulf %39, %41 : vector<4x256xf32>
    %c32 = arith.constant 32 : index
    %c0_21 = arith.constant 0 : index
    %43 = vector.load %arg6[%c32, %c0_21] : memref<77x256xf32, #tpu.memory_space<vmem>>, vector<4x256xf32>
    tpu.vector_store %arg6[%c32, %c0_21], %42 {strides = array<i32>} : memref<77x256xf32, #tpu.memory_space<vmem>>, vector<4x256xf32>,
    %c36 = arith.constant 36 : index
    %c0_22 = arith.constant 0 : index
    %44 = vector.load %arg6[%c36, %c0_22] : memref<77x256xf32, #tpu.memory_space<vmem>>, vector<1x256xf32>
    tpu.vector_store %arg6[%c36, %c0_22], %0 {strides = array<i32>} : memref<77x256xf32, #tpu.memory_space<vmem>>, vector<1x256xf32>,
    %c0_23 = arith.constant 0 : index
    %c0_24 = arith.constant 0 : index
    %45 = vector.load %arg3[%c0_23, %c0_24] : memref<8x37xbf16, #tpu.memory_space<vmem>>, vector<8x37xbf16>
    %c0_25 = arith.constant 0 : index
    %c0_26 = arith.constant 0 : index
    %46 = vector.load %arg6[%c0_25, %c0_26] : memref<77x256xf32, #tpu.memory_space<vmem>>, vector<37x256xf32>
    %47 = arith.truncf %46 : vector<37x256xf32> to vector<37x256xbf16>
    %cst_27 = arith.constant dense<0.000000e+00> : vector<8x256xf32>
    %48 = tpu.matmul %45, %47, %cst_27 {dimension_numbers = #tpu.dot_dimension_numbers<[1], [0], [0], [1], [0, 0, 1, 1], [], []>} : vector<8x37xbf16>, vector<37x256xbf16>, vector<8x256xf32> -> vector<8x256xf32>
    %cst_28 = arith.constant 0.000000e+00 : f32
    %49 = vector.broadcast %cst_28 : f32 to vector<8x256xf32>
    %50 = arith.maximumf %48, %49 : vector<8x256xf32>
    %c17_i32_29 = arith.constant 17 : i32
    %51 = tpu.dynamic_rotate %50 by %c17_i32_29 dim 1 : vector<8x256xf32>, i32 -> vector<8x256xf32>
    %c0_30 = arith.constant 0 : index
    %c0_31 = arith.constant 0 : index
    %52 = vector.load %arg1[%c0_30, %c0_31] : memref<8x256xf32, #tpu.memory_space<vmem>>, vector<1x256xf32>
    %53 = vector.broadcast %52 : vector<1x256xf32> to vector<8x256xf32>
    %54 = arith.mulf %51, %53 : vector<8x256xf32>
    %c0_32 = arith.constant 0 : index
    %c0_33 = arith.constant 0 : index
    %55 = vector.load %arg6[%c0_32, %c0_33] : memref<77x256xf32, #tpu.memory_space<vmem>>, vector<8x256xf32>
    tpu.vector_store %arg6[%c0_32, %c0_33], %54 {strides = array<i32>} : memref<77x256xf32, #tpu.memory_space<vmem>>, vector<8x256xf32>,
    %c16_i32_34 = arith.constant 16 : i32
    %56 = tpu.dynamic_rotate %50 by %c16_i32_34 dim 1 : vector<8x256xf32>, i32 -> vector<8x256xf32>
    %c1_35 = arith.constant 1 : index
    %c0_36 = arith.constant 0 : index
    %57 = vector.load %arg1[%c1_35, %c0_36] : memref<8x256xf32, #tpu.memory_space<vmem>>, vector<1x256xf32>
    %58 = vector.broadcast %57 : vector<1x256xf32> to vector<8x256xf32>
    %59 = arith.mulf %56, %58 : vector<8x256xf32>
    %c8_37 = arith.constant 8 : index
    %c0_38 = arith.constant 0 : index
    %60 = vector.load %arg6[%c8_37, %c0_38] : memref<77x256xf32, #tpu.memory_space<vmem>>, vector<8x256xf32>
    tpu.vector_store %arg6[%c8_37, %c0_38], %59 {strides = array<i32>} : memref<77x256xf32, #tpu.memory_space<vmem>>, vector<8x256xf32>,
    %c15_i32_39 = arith.constant 15 : i32
    %61 = tpu.dynamic_rotate %50 by %c15_i32_39 dim 1 : vector<8x256xf32>, i32 -> vector<8x256xf32>
    %c2_40 = arith.constant 2 : index
    %c0_41 = arith.constant 0 : index
    %62 = vector.load %arg1[%c2_40, %c0_41] : memref<8x256xf32, #tpu.memory_space<vmem>>, vector<1x256xf32>
    %63 = vector.broadcast %62 : vector<1x256xf32> to vector<8x256xf32>
    %64 = arith.mulf %61, %63 : vector<8x256xf32>
    %c16_42 = arith.constant 16 : index
    %c0_43 = arith.constant 0 : index
    %65 = vector.load %arg6[%c16_42, %c0_43] : memref<77x256xf32, #tpu.memory_space<vmem>>, vector<8x256xf32>
    tpu.vector_store %arg6[%c16_42, %c0_43], %64 {strides = array<i32>} : memref<77x256xf32, #tpu.memory_space<vmem>>, vector<8x256xf32>,
    %c1_i32_44 = arith.constant 1 : i32
    %66 = tpu.dynamic_rotate %50 by %c1_i32_44 dim 1 : vector<8x256xf32>, i32 -> vector<8x256xf32>
    %c3_45 = arith.constant 3 : index
    %c0_46 = arith.constant 0 : index
    %67 = vector.load %arg1[%c3_45, %c0_46] : memref<8x256xf32, #tpu.memory_space<vmem>>, vector<1x256xf32>
    %68 = vector.broadcast %67 : vector<1x256xf32> to vector<8x256xf32>
    %69 = arith.mulf %66, %68 : vector<8x256xf32>
    %c24_47 = arith.constant 24 : index
    %c0_48 = arith.constant 0 : index
    %70 = vector.load %arg6[%c24_47, %c0_48] : memref<77x256xf32, #tpu.memory_space<vmem>>, vector<8x256xf32>
    tpu.vector_store %arg6[%c24_47, %c0_48], %69 {strides = array<i32>} : memref<77x256xf32, #tpu.memory_space<vmem>>, vector<8x256xf32>,
    %c32_49 = arith.constant 32 : index
    %c0_50 = arith.constant 0 : index
    %71 = vector.load %arg6[%c32_49, %c0_50] : memref<77x256xf32, #tpu.memory_space<vmem>>, vector<8x256xf32>
    tpu.vector_store %arg6[%c32_49, %c0_50], %50 {strides = array<i32>} : memref<77x256xf32, #tpu.memory_space<vmem>>, vector<8x256xf32>,
    %c255_i32_51 = arith.constant 255 : i32
    %72 = tpu.dynamic_rotate %50 by %c255_i32_51 dim 1 : vector<8x256xf32>, i32 -> vector<8x256xf32>
    %c4_52 = arith.constant 4 : index
    %c0_53 = arith.constant 0 : index
    %73 = vector.load %arg1[%c4_52, %c0_53] : memref<8x256xf32, #tpu.memory_space<vmem>>, vector<1x256xf32>
    %74 = vector.broadcast %73 : vector<1x256xf32> to vector<8x256xf32>
    %75 = arith.mulf %72, %74 : vector<8x256xf32>
    %c40 = arith.constant 40 : index
    %c0_54 = arith.constant 0 : index
    %76 = vector.load %arg6[%c40, %c0_54] : memref<77x256xf32, #tpu.memory_space<vmem>>, vector<8x256xf32>
    tpu.vector_store %arg6[%c40, %c0_54], %75 {strides = array<i32>} : memref<77x256xf32, #tpu.memory_space<vmem>>, vector<8x256xf32>,
    %c241_i32_55 = arith.constant 241 : i32
    %77 = tpu.dynamic_rotate %50 by %c241_i32_55 dim 1 : vector<8x256xf32>, i32 -> vector<8x256xf32>
    %c5_56 = arith.constant 5 : index
    %c0_57 = arith.constant 0 : index
    %78 = vector.load %arg1[%c5_56, %c0_57] : memref<8x256xf32, #tpu.memory_space<vmem>>, vector<1x256xf32>
    %79 = vector.broadcast %78 : vector<1x256xf32> to vector<8x256xf32>
    %80 = arith.mulf %77, %79 : vector<8x256xf32>
    %c48 = arith.constant 48 : index
    %c0_58 = arith.constant 0 : index
    %81 = vector.load %arg6[%c48, %c0_58] : memref<77x256xf32, #tpu.memory_space<vmem>>, vector<8x256xf32>
    tpu.vector_store %arg6[%c48, %c0_58], %80 {strides = array<i32>} : memref<77x256xf32, #tpu.memory_space<vmem>>, vector<8x256xf32>,
    %c240_i32_59 = arith.constant 240 : i32
    %82 = tpu.dynamic_rotate %50 by %c240_i32_59 dim 1 : vector<8x256xf32>, i32 -> vector<8x256xf32>
    %c6_60 = arith.constant 6 : index
    %c0_61 = arith.constant 0 : index
    %83 = vector.load %arg1[%c6_60, %c0_61] : memref<8x256xf32, #tpu.memory_space<vmem>>, vector<1x256xf32>
    %84 = vector.broadcast %83 : vector<1x256xf32> to vector<8x256xf32>
    %85 = arith.mulf %82, %84 : vector<8x256xf32>
    %c56 = arith.constant 56 : index
    %c0_62 = arith.constant 0 : index
    %86 = vector.load %arg6[%c56, %c0_62] : memref<77x256xf32, #tpu.memory_space<vmem>>, vector<8x256xf32>
    tpu.vector_store %arg6[%c56, %c0_62], %85 {strides = array<i32>} : memref<77x256xf32, #tpu.memory_space<vmem>>, vector<8x256xf32>,
    %c239_i32_63 = arith.constant 239 : i32
    %87 = tpu.dynamic_rotate %50 by %c239_i32_63 dim 1 : vector<8x256xf32>, i32 -> vector<8x256xf32>
    %c7_64 = arith.constant 7 : index
    %c0_65 = arith.constant 0 : index
    %88 = vector.load %arg1[%c7_64, %c0_65] : memref<8x256xf32, #tpu.memory_space<vmem>>, vector<1x256xf32>
    %89 = vector.broadcast %88 : vector<1x256xf32> to vector<8x256xf32>
    %90 = arith.mulf %87, %89 : vector<8x256xf32>
    %c64 = arith.constant 64 : index
    %c0_66 = arith.constant 0 : index
    %91 = vector.load %arg6[%c64, %c0_66] : memref<77x256xf32, #tpu.memory_space<vmem>>, vector<8x256xf32>
    tpu.vector_store %arg6[%c64, %c0_66], %90 {strides = array<i32>} : memref<77x256xf32, #tpu.memory_space<vmem>>, vector<8x256xf32>,
    %c72 = arith.constant 72 : index
    %c0_67 = arith.constant 0 : index
    %92 = vector.load %arg6[%c72, %c0_67] : memref<77x256xf32, #tpu.memory_space<vmem>>, vector<4x256xf32>
    tpu.vector_store %arg6[%c72, %c0_67], %2 {strides = array<i32>} : memref<77x256xf32, #tpu.memory_space<vmem>>, vector<4x256xf32>,
    %c76 = arith.constant 76 : index
    %c0_68 = arith.constant 0 : index
    %93 = vector.load %arg6[%c76, %c0_68] : memref<77x256xf32, #tpu.memory_space<vmem>>, vector<1x256xf32>
    tpu.vector_store %arg6[%c76, %c0_68], %0 {strides = array<i32>} : memref<77x256xf32, #tpu.memory_space<vmem>>, vector<1x256xf32>,
    %c0_69 = arith.constant 0 : index
    %c0_70 = arith.constant 0 : index
    %94 = vector.load %arg4[%c0_69, %c0_70] : memref<8x77xbf16, #tpu.memory_space<vmem>>, vector<8x77xbf16>
    %c0_71 = arith.constant 0 : index
    %c0_72 = arith.constant 0 : index
    %95 = vector.load %arg6[%c0_71, %c0_72] : memref<77x256xf32, #tpu.memory_space<vmem>>, vector<77x256xf32>
    %96 = arith.truncf %95 : vector<77x256xf32> to vector<77x256xbf16>
    %cst_73 = arith.constant dense<0.000000e+00> : vector<8x256xf32>
    %97 = tpu.matmul %94, %96, %cst_73 {dimension_numbers = #tpu.dot_dimension_numbers<[1], [0], [0], [1], [0, 0, 1, 1], [], []>} : vector<8x77xbf16>, vector<77x256xbf16>, vector<8x256xf32> -> vector<8x256xf32>
    %cst_74 = arith.constant 0.000000e+00 : f32
    %98 = vector.broadcast %cst_74 : f32 to vector<8x256xf32>
    %99 = arith.maximumf %97, %98 : vector<8x256xf32>
    %c0_75 = arith.constant 0 : index
    %c0_76 = arith.constant 0 : index
    %c0_77 = arith.constant 0 : index
    %100 = vector.load %arg5[%c0_75, %c0_76, %c0_77] : memref<1x8x256xf32, #tpu.memory_space<vmem>>, vector<1x8x256xf32>
    %101 = vector.shape_cast %100 : vector<1x8x256xf32> to vector<8x256xf32>
    %102 = vector.shape_cast %99 : vector<8x256xf32> to vector<1x8x256xf32>
    tpu.vector_store %arg5[%c0_75, %c0_76, %c0_77], %102 {strides = array<i32>} : memref<1x8x256xf32, #tpu.memory_space<vmem>>, vector<1x8x256xf32>,
    return
  }
  func.func @transform_0(%arg0: i32) -> (i32, i32) {
    %c0_i32 = arith.constant 0 : i32
    %c0_i32_0 = arith.constant 0 : i32
    %c0_i32_1 = arith.constant 0 : i32
    return %c0_i32, %c0_i32_0 : i32, i32
  }
  func.func @transform_1(%arg0: i32) -> (i32, i32, i32) {
    %c0_i32 = arith.constant 0 : i32
    %c0_i32_0 = arith.constant 0 : i32
    %c0_i32_1 = arith.constant 0 : i32
    return %arg0, %c0_i32, %c0_i32_0 : i32, i32, i32
  }
  func.func @transform_2(%arg0: i32) -> (i32, i32) {
    %c0_i32 = arith.constant 0 : i32
    %c0_i32_0 = arith.constant 0 : i32
    %c0_i32_1 = arith.constant 0 : i32
    return %c0_i32, %c0_i32_0 : i32, i32
  }
  func.func @transform_3(%arg0: i32) -> (i32, i32) {
    %c0_i32 = arith.constant 0 : i32
    %c0_i32_0 = arith.constant 0 : i32
    %c0_i32_1 = arith.constant 0 : i32
    return %c0_i32, %c0_i32_0 : i32, i32
  }
  func.func @transform_4(%arg0: i32) -> (i32, i32, i32) {
    %c0_i32 = arith.constant 0 : i32
    %c0_i32_0 = arith.constant 0 : i32
    %c0_i32_1 = arith.constant 0 : i32
    return %arg0, %c0_i32, %c0_i32_0 : i32, i32, i32
  }
}

</mosaic_0001>

<bundles_post_ra>
// kernel: tpu_custom_call.1
= control target key start
LH: loop header
LB: loop body
LE: loop exit
PB: predicated region body
PF: predicated region fallthrough
CT: control target
= control target key end

     0   :  { %9 = vsyncpa [#allocation4], 0  ;;  %s1517_s0 = inlined_call_operand.hbm [shape: f32[8,256], index: 0, kind: input, shape index: {}]   ;;  %s1518_s1 = inlined_call_operand.hbm [shape: f32[2,4,256], index: 1, kind: input, shape index: {}]   ;;  %s1519_s2 = inlined_call_operand.hbm [shape: bf16[8,37], index: 2, kind: input, shape index: {}]   ;;  %s1520_s3 = inlined_call_operand.hbm [shape: bf16[8,77], index: 3, kind: input, shape index: {}]   ;;  %s1521_s4 = inlined_call_operand.hbm [shape: f32[2,8,256], index: 4, kind: output, shape index: {}]  }
   0x1   :  { %10 = vsyncpa [#allocation7], 0 }
   0x2   :  { %12 = vsyncpa [#allocation7 + $0x1], 0 }
   0x3   :  { %13 = vsyncpa [#allocation10], 0 }
   0x4   :  { %14 = vsyncpa [#allocation5], 0 }
   0x5   :  { %16 = vsyncpa [#allocation5 + $0x1], 0  ;;  %s1229_s15 = smov 0   ;;  %s1231_s16 = smov 0  }
   0x6   :  { %s1233_s17 = smov 0   ;;  %s1235_s18 = smov 0  }
   0x7 LB: > { %s1250_s19 = sadd.s32 4294967295, %s1189_s18   ;;  %s878_s20 = sadd.s32 4294967294, %s1189_s18   ;;  %s1189_s18 = sphi %s1235_s18, %s1531_s18   ;;  %s1185_s17 = sphi %s1233_s17, %s1530_s17   ;;  %s1181_s16 = sphi %s1231_s16, %s1529_s16   ;;  %s1177_s15 = sphi %s1229_s15, %s1528_s15  }
   0x8   : > { %p63_p0 = scmp.ne.s32.totalorder %s1181_s16, %s1177_s15  ;;  %p64_p1 = scmp.eq.s32.totalorder %s1250_s19, 0 }
   0x9   : > { %p129_p2 = scmp.eq.s32.totalorder %s1250_s19, 1  ;;  %p135_p3 = scmp.eq.s32.totalorder %s878_s20, 1 }
   0xa   : > { %p1259_p4 = por %p64_p1, %p63_p0  ;;  %p879_p5 = scmp.ge.s32.totalorder %s1189_s18, 1 }
   0xb   : > { %p1264_p6 = por %p135_p3, %p63_p0  ;;  %p142_p7 = scmp.lt.s32.totalorder %s1189_s18, 3 }
   0xc   : > { %s166_s25 = sshll.u32 %s1519_s2, 4  ;;  %s1191_s27 = smov [#allocation8]   ;;  %s167_s25 = int_to_ptr.hbm [resolvable:$true] %s166_s25 }
   0xd   : > { %p1272_p8 = pnand %p879_p5, %p142_p7  ;;  %s168_s28 = sshll.u32 %s1191_s27, 4  ;;  %s169_s28 = int_to_ptr.vmem [resolvable:$true] %s168_s28 }
   0xe   : > { %s154_s5 = sshll.u32 %s1517_s0, 4  ;;  %s178_s8 = sshll.u32 %s1520_s3, 4  ;;  %s155_s5 = int_to_ptr.hbm [resolvable:$true] %s154_s5  ;;  %s179_s8 = int_to_ptr.hbm [resolvable:$true] %s178_s8 }
   0xf   : > { %p920_p10 = pneg %p1272_p8  ;;  %s1192_s9 = smov [#allocation3]  }
  0x10   : > { %s156_s10 = sshll.u32 %s1192_s9, 4  ;;  %s1193_s11 = smov [#allocation9]   ;;  %s157_s10 = int_to_ptr.vmem [resolvable:$true] %s156_s10 }
  0x11   : > { %p921_p11 = pnand %p920_p10, %p64_p1  ;;  %s180_s12 = sshll.u32 %s1193_s11, 4  ;;  %s181_s12 = int_to_ptr.vmem [resolvable:$true] %s180_s12 }
  0x12   : > { %s1288_s13 = sadd.s32 1, %s1189_s18   ;;  %s50_s20 = sadd.s32 1, %s1185_s17 }
  0x13   : > { %926 = dma.hbm_to_vmem [thread:$0]  (!%p921_p11), %s167_s25, 64, %s169_s28, [#allocation7]  }
  0x14   : > { %923 = dma.hbm_to_vmem [thread:$0]  (!%p921_p11), %s155_s5, 256, %s157_s10, [#allocation4]  }
  0x15   : > { %929 = dma.hbm_to_vmem [thread:$0]  (!%p921_p11), %s179_s8, 64, %s181_s12, [#allocation10]  }
  0x16   : > { %s47_s14 = ssub.s32 %s1189_s18, %s1288_s13  ;;  %p57_p13 = scmp.ne.s32.totalorder %s1185_s17, %s1181_s16 }
  0x17   : > { %p48_p12 = scmp.eq.s32.totalorder %s47_s14, 0  ;;  %p58_p0 = scmp.eq.s32.totalorder %s1189_s18, 0 }
  0x18   : > { %p941_p3 = scmp.lt.s32.totalorder %s1189_s18, 2  ;;  %p1302_p7 = por %p129_p2, %p57_p13 }
  0x19   : > { %s1298_s23 = scalar_select %p48_p12, %s1185_s17, %s50_s20  }
  0x1a   : > { %p59_p5 = por %p58_p0, %p57_p13  ;;  %s191_s25 = sand.u32 1, %s1189_s18  }
  0x1b   : > { %s193_s27 = sand.u32 1, %s1185_s17   ;;  %s902_s29 = sshll.u32 %s1189_s18, 3 }
  0x1c   : > { %s884_s28 = sshll.u32 %s193_s27, 3  ;;  %s200_s6 = scalar_lea.hbm %s1518_s1, %s902_s29 }
  0x1d   : > { %s195_s7 = scalar_lea.vmem [#allocation6], %s884_s28  ;;  %s202_s9 = sshll.u32 %s200_s6, 4  ;;  %s203_s9 = int_to_ptr.hbm [resolvable:$true] %s202_s9 }
  0x1e   : > { %s204_s8 = sshll.u32 %s195_s7, 4  ;;  %p1314_p10 = pnand %p941_p3, %p59_p5  ;;  %s205_s8 = int_to_ptr.vmem [resolvable:$true] %s204_s8 }
  0x1f   : > { %s192_s11 = scalar_lea.sflag [#allocation7], %s191_s25  ;;  %s1081_s12 = sshra.s32 %s203_s9, 4  ;;  %s1082_s12 = int_to_ptr.hbm [resolvable:$true] %s1081_s12 }
  0x20   : > { %s1083_s14 = scalar_lea.hbm %s1082_s12, 8  ;;  %p1085_p11 = pneg %p1314_p10 }
  0x21   : > { %p1084_p2 = scmp.ne.s32.totalorder %s1082_s12, %s1083_s14  ;;  %s1088_s28 = scalar_lea.hbm %s1518_s1, 16 }
  0x22   : > { %p1089_p0 = scmp.lt.s32.totalorder %s1082_s12, %s1518_s1  ;;  %p1090_p3 = scmp.lt.s32.totalorder %s1088_s28, %s1083_s14 }
  0x23   : > { %p1086_p12 = pnand %p1085_p11, %p1084_p2 }
  0x24   : > { %p1091_p5 = por %p1090_p3, %p1089_p0 }
  0x25   : > { %p1087_p13 = pneg %p1086_p12 }
  0x27   : > { %p1092_p9 = pnand %p1091_p5, %p1087_p13 }
  0x29   : > { %1095 = shalt.err (!%p1092_p9)
}
  0x2a   : > { %933 = dma.hbm_to_vmem [thread:$0]  (!%p1314_p10), %s203_s9, 128, %s205_s8, %s192_s11  }
  0x2b   : > { %213 = sbr.rel (%p1272_p8) target bundleno = 718 (0x2ce), region = 36 }
  0x30   : > { %1156 = dma.done.wait (%p64_p1), [#allocation4], 256  }
  0x31   : > { %1158 = vsyncadd (%p64_p1), [#allocation4], 4294967040  ;;  %s220_s25 = sand.u32 1, %s1250_s19   ;;  %s1336_s5 = sand.u32 1, %s1181_s16  }
  0x32   : > { %s889_s6 = sshll.u32 %s1336_s5, 3  ;;  %s221_s7 = scalar_lea.sflag [#allocation7], %s220_s25 }
  0x33   : > { %s224_s10 = scalar_lea.vmem [#allocation6], %s889_s6 }
  0x34   : > { %1160 = dma.done.wait (%p1259_p4), %s221_s7, 128  }
  0x35   : > { %1162 = vsyncadd (%p1259_p4), %s221_s7, 4294967168 }
  0x36   : > { %1164 = dma.done.wait (%p64_p1), [#allocation7], 64  }
  0x37   : > { %1166 = vsyncadd (%p64_p1), [#allocation7], 4294967232 }
  0x38   : > { %1168 = dma.done.wait (%p64_p1), [#allocation10], 64  }
  0x39   : > { %1170 = vsyncadd (%p64_p1), [#allocation10], 4294967232  ;;  %v261_v0 = vld [vmem:[%s224_s10] sm:$0xff]  ;;  %s1194_s21 = smov 16   ;;  %s1195_s26 = smov 1   ;;  %v272_v19 = vlaneseq  ;;  %v1202_v59 = vmov 1.0  }
  0x3a   : > { %263 = vst [vmem:[#allocation1] ss:$2 sm:$0xff] %v261_v0  ;;  %s1196_s8 = smov 127   ;;  %s1197_s9 = smov 113   ;;  %vm507_vm7 = vcmask 1041408   ;;  %vm508_vm9 = vcmask 1042432  }
  0x3b   : > { %s1198_s11 = smov 112   ;;  %s1199_s12 = smov 111   ;;  %v1367_v20 = vand.u32 127, %v272_v19  ;;  %v300_v22 = vld [vmem:[#allocation3 + $0x1] ss:$8 sm:$0x3] }
  0x3c   : > { %s1200_s14 = smov 17   ;;  %s1201_s20 = smov 15   ;;  %v302_v24 = vperm.slane %v300_v22, 0  ;;  %v303_v25 = vperm.slane %v300_v22, 1  ;;  %vm481_vm3 = vcmp.lt.s32.totalorder %v272_v19, 256  ;;  %vm503_vm11 = vcmask 302080  }
  0x3d   : > { %vm296_vm0 = vcmp.lt.s32.totalorder %v1367_v20, 16  ;;  %v352_v32 = vld [vmem:[#allocation3 + $0x3] ss:$8 sm:$0x3]  ;;  %vm348_vm1 = vcmp.lt.s32.totalorder %v1367_v20, 1  ;;  %vm436_vm2 = vcmp.lt.s32.totalorder %v1367_v20, 112 }
  0x3e   : > { %v354_v33 = vperm.slane %v352_v32, 0  ;;  %v355_v34 = vperm.slane %v352_v32, 1  ;;  %v440_v44 = vld [vmem:[#allocation3 + $0x6] ss:$8 sm:$0x3]  ;;  %vm384_vm4 = vcmp.lt.s32.totalorder %v1367_v20, 127 }
  0x3f   : > { %v442_v45 = vperm.slane %v440_v44, 0  ;;  %v443_v46 = vperm.slane %v440_v44, 1  ;;  %v388_v53 = vld [vmem:[#allocation3 + $0x4] ss:$8 sm:$0x3]  ;;  %vm413_vm5 = vcmp.lt.s32.totalorder %v1367_v20, 113 }
  0x40   : > { %v390_v56 = vperm.slane %v388_v53, 0  ;;  %v391_v57 = vperm.slane %v388_v53, 1  ;;  %484 = vst.msk [vmem:[#allocation2 + $0x44] ss:$8 sm:$0x3] %vm481_vm3, %v1202_v59  ;;  %vm465_vm6 = vcmp.lt.s32.totalorder %v1367_v20, 111 }
  0x41   : > { %v264_v1 = vld.sshfl [vmem:[#allocation1] sm:$0xff pattern:$0x75316420]  ;;  %v265_v2 = vld.sshfl [vmem:[#allocation1 + $0x8] sm:$0xff pattern:$0x75316420] }
  0x42   : > { %287 = vst [vmem:[#allocation1] ss:$2 sm:$0xff] %v261_v0  ;;  %vm274_vm8 = vcmp.lt.s32.totalorder %v1367_v20, 17  ;;  %vm325_vm10 = vcmp.lt.s32.totalorder %v1367_v20, 15  ;;  %vm720_vm12 = vcmask 1045504   ;;  %vm721_vm13 = vcmask 1046528  }
  0x43   : > { %683 = vst.msk [vmem:[#allocation2 + $0x94] ss:$8 sm:$0x3] %vm481_vm3, %v1202_v59  ;;  %vm716_vm14 = vcmask 629760   ;;  %s903_s27 = sshll.u32 %s1250_s19, 4  ;;  %s892_s28 = sshll.u32 %s1336_s5, 4 }
  0x44   : > { %s772_s25 = scalar_lea.hbm %s1521_s4, %s903_s27  ;;  %s259_s6 = scalar_lea.vmem [#allocation11], %s892_s28 }
  0x45   : > { %s774_s7 = sshll.u32 %s259_s6, 4  ;;  %s776_s10 = sshll.u32 %s772_s25, 4  ;;  %s775_s7 = int_to_ptr.vmem [resolvable:$true] %s774_s7  ;;  %s777_s10 = int_to_ptr.hbm [resolvable:$true] %s776_s10 }
  0x49   : > { %v288_v3 = vld.sshfl [vmem:[#allocation1] sm:$0xff pattern:$0x75316420]  ;;  %v289_v4 = vld.sshfl [vmem:[#allocation1 + $0x8] sm:$0xff pattern:$0x75316420] }
  0x4a   : > { %316 = vst [vmem:[#allocation1] ss:$2 sm:$0xff] %v261_v0  ;;  %294 = vrot.lane.b32.xlu0 %v289_v4, %s1194_s21  ;;  %292 = vrot.lane.b32.xlu2 %v288_v3, %s1194_s21 }
  0x51   : > { %v317_v5 = vld.sshfl [vmem:[#allocation1] sm:$0xff pattern:$0x75316420]  ;;  %v318_v6 = vld.sshfl [vmem:[#allocation1 + $0x8] sm:$0xff pattern:$0x75316420] }
  0x52   : > { %339 = vst [vmem:[#allocation1] ss:$2 sm:$0xff] %v261_v0 }
  0x59   : > { %v340_v7 = vld.sshfl [vmem:[#allocation1] sm:$0xff pattern:$0x75316420]  ;;  %v341_v8 = vld.sshfl [vmem:[#allocation1 + $0x8] sm:$0xff pattern:$0x75316420] }
  0x5a   : > { %344 = vrot.lane.b32.xlu1 %v340_v7, %s1195_s26  ;;  %368 = vst [vmem:[#allocation1] ss:$2 sm:$0xff] %v261_v0  ;;  %346 = vrot.lane.b32.xlu2 %v341_v8, %s1195_s26 }
  0x61   : > { %v369_v9 = vld.sshfl [vmem:[#allocation1] sm:$0xff pattern:$0x75316420]  ;;  %v370_v10 = vld.sshfl [vmem:[#allocation1 + $0x8] sm:$0xff pattern:$0x75316420] }
  0x62   : > { %373 = vst [vmem:[#allocation2 + $0x20] sm:$0xf] %v369_v9 }
  0x63   : > { %374 = vst [vmem:[#allocation2 + $0x28] sm:$0xf] %v370_v10 }
  0x64   : > { %375 = vst [vmem:[#allocation1] ss:$2 sm:$0xff] %v261_v0 }
  0x6b   : > { %v376_v11 = vld.sshfl [vmem:[#allocation1] sm:$0xff pattern:$0x75316420]  ;;  %v377_v12 = vld.sshfl [vmem:[#allocation1 + $0x8] sm:$0xff pattern:$0x75316420] }
  0x6c   : > { %380 = vrot.lane.b32.xlu1 %v376_v11, %s1196_s8  ;;  %404 = vst [vmem:[#allocation1] ss:$2 sm:$0xff] %v261_v0 }
  0x73   : > { %v406_v13 = vld.sshfl [vmem:[#allocation1 + $0x8] sm:$0xff pattern:$0x75316420]  ;;  %v405_v14 = vld.sshfl [vmem:[#allocation1] sm:$0xff pattern:$0x75316420] }
  0x74   : > { %382 = vrot.lane.b32.xlu1 %v377_v12, %s1196_s8  ;;  %409 = vrot.lane.b32.xlu0 %v405_v14, %s1197_s9  ;;  %427 = vst [vmem:[#allocation1] ss:$2 sm:$0xff] %v261_v0  ;;  %v469_v12 = vld [vmem:[#allocation3 + $0x7] ss:$8 sm:$0x3] }
  0x75   : > { %v472_v14 = vperm.slane %v469_v12, 1 }
  0x7b   : > { %v428_v15 = vld.sshfl [vmem:[#allocation1] sm:$0xff pattern:$0x75316420]  ;;  %v429_v16 = vld.sshfl [vmem:[#allocation1 + $0x8] sm:$0xff pattern:$0x75316420] }
  0x7c   : > { %411 = vrot.lane.b32.xlu1 %v406_v13, %s1197_s9  ;;  %456 = vst [vmem:[#allocation1] ss:$2 sm:$0xff] %v261_v0  ;;  %432 = vrot.lane.b32.xlu2 %v428_v15, %s1198_s11  ;;  %v471_v13 = vperm.slane %v469_v12, 0 }
  0x83   : > { %v457_v17 = vld.sshfl [vmem:[#allocation1] sm:$0xff pattern:$0x75316420]  ;;  %v458_v18 = vld.sshfl [vmem:[#allocation1 + $0x8] sm:$0xff pattern:$0x75316420] }
  0x84   : > { %461 = vrot.lane.b32.xlu0 %v457_v17, %s1199_s12  ;;  %675 = vst [vmem:[#allocation1] ss:$2 sm:$0xff] %v261_v0  ;;  %434 = vrot.lane.b32.xlu2 %v429_v16, %s1198_s11  ;;  %v417_v0 = vld [vmem:[#allocation3 + $0x5] ss:$8 sm:$0x3] }
  0x85   : > { %270 = vrot.lane.b32.xlu1 %v265_v2, %s1200_s14  ;;  %v419_v3 = vperm.slane %v417_v0, 0  ;;  %v420_v4 = vperm.slane %v417_v0, 1 }
  0x8c   : > { %463 = vrot.lane.b32.xlu0 %v458_v18, %s1199_s12  ;;  %321 = vrot.lane.b32.xlu2 %v317_v5, %s1201_s20 }
  0x94   : > { %268 = vrot.lane.b32.xlu0 %v264_v1, %s1200_s14 }
  0x9c   : > { %323 = vrot.lane.b32.xlu0 %v318_v6, %s1201_s20 }
  0xa4   : > { %v293_v21 = vpop.permute.xlu2 %292 }
  0xb4   : > { %v347_v36 = vpop.permute.xlu2 %346 }
  0xbc   : > { %v295_v23 = vpop.permute.xlu0 %294 }
  0xbd   : > { %v297_v26 = vsel %vm296_vm0, %v293_v21, %v295_v23  ;;  %v298_v27 = vsel %vm296_vm0, %v295_v23, %v293_v21  ;;  %v277_v21 = vld [vmem:[#allocation3] ss:$8 sm:$0x3] }
  0xbe   : > { %v306_v28 = vmul.f32 %v302_v24, %v298_v27  ;;  %v307_v29 = vmul.f32 %v303_v25, %v297_v26  ;;  %v279_v23 = vperm.slane %v277_v21, 0  ;;  %v280_v24 = vperm.slane %v277_v21, 1  ;;  %v633_v21 = vld [vmem:[#allocation3 + $0x5] ss:$8 sm:$0x3] }
  0xbf   : > { %v1203_v26 = vmov 65535  }
  0xc0   : > { %v310_v30 = vrot.slane %v306_v28, 4  ;;  %v311_v31 = vrot.slane %v307_v29, 4  ;;  %v509_v27 = vsel %vm507_vm7, 4294967295, %v1203_v26 }
  0xc2   : > { %314 = vst [vmem:[#allocation2] sm:$0xf0] %v310_v30 }
  0xc3   : > { %315 = vst [vmem:[#allocation2 + $0x8] sm:$0xf0] %v311_v31 }
  0xcc   : > { %v345_v35 = vpop.permute.xlu1 %344 }
  0xcd   : > { %v349_v37 = vsel %vm348_vm1, %v345_v35, %v347_v36  ;;  %v350_v38 = vsel %vm348_vm1, %v347_v36, %v345_v35 }
  0xce   : > { %v358_v39 = vmul.f32 %v354_v33, %v350_v38  ;;  %v359_v40 = vmul.f32 %v355_v34, %v349_v37  ;;  %v510_v33 = vsel %vm508_vm9, %v509_v27, 0  ;;  %v329_v34 = vld [vmem:[#allocation3 + $0x2] ss:$8 sm:$0x3] }
  0xd0   : > { %v362_v41 = vrot.slane %v358_v39, 4  ;;  %v363_v42 = vrot.slane %v359_v40, 4  ;;  %v331_v40 = vperm.slane %v329_v34, 0 }
  0xd2   : > { %366 = vst [vmem:[#allocation2 + $0x10] sm:$0xf0] %v362_v41  ;;  %v332_v41 = vperm.slane %v329_v34, 1 }
  0xd3   : > { %367 = vst [vmem:[#allocation2 + $0x18] sm:$0xf0] %v363_v42 }
  0xd6   : > { %v433_v43 = vpop.permute.xlu2 %432 }
  0xde   : > { %v381_v47 = vpop.permute.xlu1 %380  ;;  %v435_v48 = vpop.permute.xlu2 %434 }
  0xdf   : > { %v437_v49 = vsel %vm436_vm2, %v433_v43, %v435_v48  ;;  %v438_v50 = vsel %vm436_vm2, %v435_v48, %v433_v43 }
  0xe0   : > { %v446_v51 = vmul.f32 %v442_v45, %v437_v49  ;;  %v447_v52 = vmul.f32 %v443_v46, %v438_v50 }
  0xe2   : > { %v450_v54 = vrot.slane %v446_v51, 4  ;;  %v451_v55 = vrot.slane %v447_v52, 4 }
  0xe4   : > { %454 = vst [vmem:[#allocation2 + $0x30] sm:$0xf0] %v450_v54 }
  0xe5   : > { %455 = vst [vmem:[#allocation2 + $0x38] sm:$0xf0] %v451_v55 }
  0xe6   : > { %v383_v58 = vpop.permute.xlu1 %382  ;;  %v410_v5 = vpop.permute.xlu0 %409 }
  0xe7   : > { %v385_v60 = vsel %vm384_vm4, %v381_v47, %v383_v58  ;;  %v386_v61 = vsel %vm384_vm4, %v383_v58, %v381_v47  ;;  %v322_v38 = vpop.permute.xlu2 %321 }
  0xe8   : > { %v394_v62 = vmul.f32 %v390_v56, %v385_v60  ;;  %v395_v63 = vmul.f32 %v391_v57, %v386_v61  ;;  %v486_v60 = vld [vmem:[#allocation8] sm:$0xf] }
  0xea   : > { %v398_v1 = vrot.slane %v394_v62, 4  ;;  %v399_v2 = vrot.slane %v395_v63, 4 }
  0xec   : > { %402 = vst [vmem:[#allocation2 + $0x20] sm:$0xf0] %v398_v1 }
  0xed   : > { %403 = vst [vmem:[#allocation2 + $0x28] sm:$0xf0] %v399_v2 }
  0xee   : > { %v412_v6 = vpop.permute.xlu1 %411 }
  0xef   : > { %v414_v7 = vsel %vm413_vm5, %v410_v5, %v412_v6  ;;  %v415_v8 = vsel %vm413_vm5, %v412_v6, %v410_v5  ;;  %v665_v6 = vld [vmem:[#allocation3 + $0x7] ss:$8 sm:$0x3] }
  0xf0   : > { %v423_v9 = vmul.f32 %v419_v3, %v414_v7  ;;  %v424_v10 = vmul.f32 %v420_v4, %v415_v8  ;;  %v676_v3 = vld.sshfl [vmem:[#allocation1] sm:$0xff pattern:$0x75316420]  ;;  %v677_v4 = vld.sshfl [vmem:[#allocation1 + $0x8] sm:$0xff pattern:$0x75316420] }
  0xf1   : > { %680 = vst [vmem:[#allocation2 + $0x90] sm:$0xf] %v676_v3  ;;  %v667_v7 = vperm.slane %v665_v6, 0  ;;  %v668_v8 = vperm.slane %v665_v6, 1 }
  0xf2   : > { %425 = vst [vmem:[#allocation2 + $0x30] sm:$0xf] %v423_v9 }
  0xf3   : > { %426 = vst [vmem:[#allocation2 + $0x38] sm:$0xf] %v424_v10  ;;  %v491_v43 = vld [vmem:[#allocation2 + $0x20] sm:$0xff] }
  0xf4   : > { %v492_v46 = vld [vmem:[#allocation2 + $0x28] sm:$0xff]  ;;  %681 = vst [vmem:[#allocation2 + $0x98] sm:$0xf] %v677_v4 }
  0xf6   : > { %v462_v11 = vpop.permute.xlu0 %461 }
  0xf7   : > { %v271_v22 = vpop.permute.xlu1 %270 }
  0xf9   : > { %v493_v44 = vld [vmem:[#allocation2 + $0x30] sm:$0xff] }
  0xfa   : > { %v494_v47 = vld [vmem:[#allocation2 + $0x38] sm:$0xff]  ;;  %v499_v52 = vpack.c.bf16 %v493_v44, %v491_v43 }
  0xfb   : > { %v500_v53 = vpack.c.bf16 %v494_v47, %v492_v46 }
  0xfe   : > { %v464_v15 = vpop.permute.xlu0 %463 }
  0xff   : > { %v466_v16 = vsel %vm465_vm6, %v462_v11, %v464_v15  ;;  %v467_v17 = vsel %vm465_vm6, %v464_v15, %v462_v11  ;;  %v722_v11 = vsel %vm720_vm12, 4294967295, %v1203_v26  ;;  %v705_v15 = vld [vmem:[#allocation2 + $0x98] sm:$0x1f]  ;;  %v636_v26 = vperm.slane %v633_v21, 1 }
 0x100   : > { %v475_v18 = vmul.f32 %v471_v13, %v466_v16  ;;  %v476_v19 = vmul.f32 %v472_v14, %v467_v17  ;;  %v704_v14 = vld [vmem:[#allocation2 + $0x90] sm:$0x1f] }
 0x102   : > { %477 = vst [vmem:[#allocation2 + $0x40] sm:$0xf] %v475_v18 }
 0x103   : > { %478 = vst [vmem:[#allocation2 + $0x48] sm:$0xf] %v476_v19  ;;  %v649_v19 = vld [vmem:[#allocation3 + $0x6] ss:$8 sm:$0x3] }
 0x104   : > { %v652_v27 = vperm.slane %v649_v19, 1 }
 0x106   : > { %v269_v25 = vpop.permute.xlu0 %268 }
 0x107   : > { %v275_v28 = vsel %vm274_vm8, %v269_v25, %v271_v22  ;;  %v276_v29 = vsel %vm274_vm8, %v271_v22, %v269_v25  ;;  %v723_v22 = vsel %vm721_vm13, %v722_v11, 0  ;;  %v651_v25 = vperm.slane %v649_v19, 0  ;;  %v567_v19 = vld [vmem:[#allocation3 + $0x1] ss:$8 sm:$0x3] }
 0x108   : > { %v283_v30 = vmul.f32 %v279_v23, %v276_v29  ;;  %v284_v31 = vmul.f32 %v280_v24, %v275_v28  ;;  %v635_v28 = vperm.slane %v633_v21, 0  ;;  %v569_v21 = vperm.slane %v567_v19, 0 }
 0x109   : > { %v495_v32 = vld [vmem:[#allocation2 + $0x40] sm:$0x1f] }
 0x10a   : > { %285 = vst [vmem:[#allocation2] sm:$0xf] %v283_v30  ;;  %v501_v35 = vpack.c.bf16 %v495_v32, %v495_v32  ;;  %v496_v36 = vld [vmem:[#allocation2 + $0x48] sm:$0x1f] }
 0x10b   : > { %286 = vst [vmem:[#allocation2 + $0x8] sm:$0xf] %v284_v31  ;;  %v502_v37 = vpack.c.bf16 %v496_v36, %v496_v36 }
 0x10c   : > { %v512_v39 = vand.u32 %v510_v33, %v501_v35 }
 0x10d   : > { %v515_v42 = vand.u32 %v510_v33, %v502_v37 }
 0x10e   : > { %522 = vmatpush.bf16.msra.mxu0 %v512_v39  ;;  %v324_v45 = vpop.permute.xlu0 %323 }
 0x10f   : > { %535 = vmatpush.bf16.msra.mxu1 %v515_v42  ;;  %v326_v48 = vsel %vm325_vm10, %v322_v38, %v324_v45  ;;  %v327_v49 = vsel %vm325_vm10, %v324_v45, %v322_v38 }
 0x110   : > { %v335_v50 = vmul.f32 %v331_v40, %v327_v49  ;;  %v336_v51 = vmul.f32 %v332_v41, %v326_v48  ;;  %v617_v41 = vld [vmem:[#allocation3 + $0x4] ss:$8 sm:$0x3] }
 0x111   : > { %v487_v54 = vld [vmem:[#allocation2] sm:$0xff]  ;;  %v619_v45 = vperm.slane %v617_v41, 0  ;;  %v620_v46 = vperm.slane %v617_v41, 1 }
 0x112   : > { %337 = vst [vmem:[#allocation2 + $0x10] sm:$0xf] %v335_v50  ;;  %523 = vmatpush.bf16.msra.mxu0 %v499_v52  ;;  %v488_v57 = vld [vmem:[#allocation2 + $0x8] sm:$0xff] }
 0x113   : > { %338 = vst [vmem:[#allocation2 + $0x18] sm:$0xf] %v336_v51  ;;  %536 = vmatpush.bf16.msra.mxu1 %v500_v53  ;;  %v599_v53 = vld [vmem:[#allocation3 + $0x3] ss:$8 sm:$0x3] }
 0x119   : > { %v489_v55 = vld [vmem:[#allocation2 + $0x10] sm:$0xff] }
 0x11a   : > { %v497_v56 = vpack.c.bf16 %v489_v55, %v487_v54  ;;  %v490_v58 = vld [vmem:[#allocation2 + $0x18] sm:$0xff]  ;;  %v583_v54 = vld [vmem:[#allocation3 + $0x2] ss:$8 sm:$0x3] }
 0x11b   : > { %v498_v59 = vpack.c.bf16 %v490_v58, %v488_v57  ;;  %v601_v58 = vperm.slane %v599_v53, 0 }
 0x11c   : > { %524 = vmatpush.bf16.msra.mxu0 %v497_v56 }
 0x11d   : > { %537 = vmatpush.bf16.msra.mxu1 %v498_v59  ;;  %v602_v59 = vperm.slane %v599_v53, 1 }
 0x11f   : > { %893 = vmatmul.msk.bf16.vlgmr.msra.gmra.mxu0 %vm503_vm11, %v486_v60 }
 0x120   : > { %894 = vmatmul.msk.bf16.vlgmr.msra.gmra.mxu1 %vm503_vm11, %v486_v60  ;;  %v585_v60 = vperm.slane %v583_v54, 0 }
 0x19c   : > { %v526_v61 = vpop.f32.mrf.mxu0 }
 0x19d   : > { %v1410_v62 = vmax.f32 %v526_v61, 0.0  ;;  %v539_v63 = vpop.f32.mrf.mxu1  ;;  %v586_v61 = vperm.slane %v583_v54, 1 }
 0x19e   : > { %v1412_v0 = vmax.f32 %v539_v63, 0.0 }
 0x19f   : > { %609 = vst [vmem:[#allocation2 + $0x40] sm:$0xff] %v1410_v62  ;;  %627 = vrot.lane.b32.xlu0 %v1410_v62, %s1197_s9  ;;  %659 = vrot.lane.b32.xlu1 %v1410_v62, %s1199_s12 }
 0x1a0   : > { %610 = vst [vmem:[#allocation2 + $0x48] sm:$0xff] %v1412_v0  ;;  %661 = vrot.lane.b32.xlu2 %v1412_v0, %s1199_s12 }
 0x1a4   : > { %v528_v1 = vpop.f32.mrf.mxu0 }
 0x1a5   : > { %v541_v2 = vpop.f32.mrf.mxu1 }
 0x1a7   : > { %645 = vrot.lane.b32.xlu0 %v1412_v0, %s1198_s11  ;;  %629 = vrot.lane.b32.xlu1 %v1412_v0, %s1197_s9 }
 0x1a8   : > { %643 = vrot.lane.b32.xlu2 %v1410_v62, %s1198_s11  ;;  %s1131_s11 = scalar_lea.hbm %s1521_s4, 32 }
 0x1af   : > { %577 = vrot.lane.b32.xlu0 %v1410_v62, %s1201_s20  ;;  %611 = vrot.lane.b32.xlu1 %v1410_v62, %s1196_s8 }
 0x1b0   : > { %613 = vrot.lane.b32.xlu2 %v1412_v0, %s1196_s8 }
 0x1b7   : > { %595 = vrot.lane.b32.xlu0 %v1412_v0, %s1195_s26  ;;  %579 = vrot.lane.b32.xlu1 %v1412_v0, %s1201_s20 }
 0x1b8   : > { %593 = vrot.lane.b32.xlu2 %v1410_v62, %s1195_s26  ;;  %s1125_s26 = sshra.s32 %s777_s10, 4  ;;  %s1126_s26 = int_to_ptr.hbm [resolvable:$true] %s1125_s26 }
 0x1b9   : > { %s1127_s19 = scalar_lea.hbm %s1126_s26, 16  ;;  %p1132_p9 = scmp.lt.s32.totalorder %s1126_s26, %s1521_s4 }
 0x1ba   : > { %p1128_p1 = scmp.ne.s32.totalorder %s1126_s26, %s1127_s19  ;;  %p1133_p10 = scmp.lt.s32.totalorder %s1131_s11, %s1127_s19 }
 0x1bc   : > { %p1129_p4 = pnand %p1128_p1, %p1302_p7  ;;  %p1134_p2 = por %p1133_p10, %p1132_p9 }
 0x1be   : > { %p1130_p8 = pneg %p1129_p4 }
 0x1bf   : > { %561 = vrot.lane.b32.xlu0 %v1410_v62, %s1194_s21  ;;  %545 = vrot.lane.b32.xlu1 %v1410_v62, %s1200_s14 }
 0x1c0   : > { %547 = vrot.lane.b32.xlu2 %v1412_v0, %s1200_s14  ;;  %p1135_p11 = pnand %p1134_p2, %p1130_p8 }
 0x1c7   : > { %563 = vrot.lane.b32.xlu1 %v1412_v0, %s1194_s21  ;;  %s761_s21 = scalar_lea.sflag [#allocation5], %s1336_s5 }
 0x1fa   : > { %v662_v5 = vpop.permute.xlu2 %661 }
 0x202   : > { %v644_v16 = vpop.permute.xlu2 %643 }
 0x20a   : > { %v614_v42 = vpop.permute.xlu2 %613 }
 0x211   : > { %v628_v9 = vpop.permute.xlu0 %627  ;;  %v660_v10 = vpop.permute.xlu1 %659 }
 0x212   : > { %v663_v12 = vsel %vm465_vm6, %v660_v10, %v662_v5  ;;  %v664_v13 = vsel %vm465_vm6, %v662_v5, %v660_v10  ;;  %v594_v57 = vpop.permute.xlu2 %593 }
 0x213   : > { %v671_v17 = vmul.f32 %v667_v7, %v663_v12  ;;  %v672_v18 = vmul.f32 %v668_v8, %v664_v13  ;;  %v551_v8 = vld [vmem:[#allocation3] ss:$8 sm:$0x3] }
 0x214   : > { %v553_v11 = vperm.slane %v551_v8, 0  ;;  %v554_v12 = vperm.slane %v551_v8, 1 }
 0x215   : > { %v714_v23 = vpack.c.bf16 %v704_v14, %v671_v17  ;;  %v715_v24 = vpack.c.bf16 %v705_v15, %v672_v18 }
 0x217   : > { %v725_v29 = vand.u32 %v723_v22, %v714_v23  ;;  %v728_v30 = vand.u32 %v723_v22, %v715_v24  ;;  %v570_v22 = vperm.slane %v567_v19, 1 }
 0x219   : > { %v646_v31 = vpop.permute.xlu0 %645  ;;  %v630_v32 = vpop.permute.xlu1 %629  ;;  %733 = vmatpush.bf16.msra.mxu2 %v725_v29  ;;  %746 = vmatpush.bf16.msra.mxu3 %v728_v30 }
 0x21a   : > { %v647_v33 = vsel %vm436_vm2, %v644_v16, %v646_v31  ;;  %v648_v34 = vsel %vm436_vm2, %v646_v31, %v644_v16  ;;  %v631_v35 = vsel %vm413_vm5, %v628_v9, %v630_v32  ;;  %v632_v36 = vsel %vm413_vm5, %v630_v32, %v628_v9  ;;  %v548_v13 = vpop.permute.xlu2 %547  ;;  %v685_v31 = vld [vmem:[#allocation9] sm:$0xf] }
 0x21b   : > { %v655_v37 = vmul.f32 %v651_v25, %v647_v33  ;;  %v656_v38 = vmul.f32 %v652_v27, %v648_v34  ;;  %v639_v39 = vmul.f32 %v635_v28, %v631_v35  ;;  %v640_v40 = vmul.f32 %v636_v26, %v632_v36 }
 0x21d   : > { %v712_v43 = vpack.c.bf16 %v655_v37, %v639_v39  ;;  %v713_v44 = vpack.c.bf16 %v656_v38, %v640_v40 }
 0x21f   : > { %734 = vmatpush.bf16.msra.mxu2 %v712_v43  ;;  %747 = vmatpush.bf16.msra.mxu3 %v713_v44 }
 0x221   : > { %v578_v47 = vpop.permute.xlu0 %577  ;;  %v612_v48 = vpop.permute.xlu1 %611 }
 0x222   : > { %v615_v49 = vsel %vm384_vm4, %v612_v48, %v614_v42  ;;  %v616_v50 = vsel %vm384_vm4, %v614_v42, %v612_v48 }
 0x223   : > { %v623_v51 = vmul.f32 %v619_v45, %v615_v49  ;;  %v624_v52 = vmul.f32 %v620_v46, %v616_v50 }
 0x225   : > { %v710_v55 = vpack.c.bf16 %v623_v51, %v1410_v62  ;;  %v711_v56 = vpack.c.bf16 %v624_v52, %v1412_v0 }
 0x227   : > { %735 = vmatpush.bf16.msra.mxu2 %v710_v55  ;;  %748 = vmatpush.bf16.msra.mxu3 %v711_v56 }
 0x229   : > { %v596_v63 = vpop.permute.xlu0 %595  ;;  %v580_v1 = vpop.permute.xlu1 %579 }
 0x22a   : > { %v597_v2 = vsel %vm348_vm1, %v594_v57, %v596_v63  ;;  %v598_v3 = vsel %vm348_vm1, %v596_v63, %v594_v57  ;;  %v581_v62 = vsel %vm325_vm10, %v578_v47, %v580_v1  ;;  %v582_v0 = vsel %vm325_vm10, %v580_v1, %v578_v47 }
 0x22b   : > { %v605_v4 = vmul.f32 %v601_v58, %v598_v3  ;;  %v606_v5 = vmul.f32 %v602_v59, %v597_v2  ;;  %v589_v6 = vmul.f32 %v585_v60, %v582_v0  ;;  %v590_v7 = vmul.f32 %v586_v61, %v581_v62 }
 0x22d   : > { %607 = vst [vmem:[#allocation2 + $0x30] sm:$0xff] %v605_v4  ;;  %v708_v9 = vpack.c.bf16 %v605_v4, %v589_v6  ;;  %v709_v10 = vpack.c.bf16 %v606_v5, %v590_v7 }
 0x22e   : > { %608 = vst [vmem:[#allocation2 + $0x38] sm:$0xff] %v606_v5 }
 0x22f   : > { %591 = vst [vmem:[#allocation2 + $0x20] sm:$0xff] %v589_v6  ;;  %736 = vmatpush.bf16.msra.mxu2 %v708_v9  ;;  %749 = vmatpush.bf16.msra.mxu3 %v709_v10 }
 0x230   : > { %592 = vst [vmem:[#allocation2 + $0x28] sm:$0xff] %v590_v7 }
 0x231   : > { %v546_v14 = vpop.permute.xlu1 %545  ;;  %v562_v23 = vpop.permute.xlu0 %561 }
 0x232   : > { %v549_v15 = vsel %vm274_vm8, %v546_v14, %v548_v13  ;;  %v550_v16 = vsel %vm274_vm8, %v548_v13, %v546_v14 }
 0x233   : > { %v557_v17 = vmul.f32 %v553_v11, %v550_v16  ;;  %v558_v18 = vmul.f32 %v554_v12, %v549_v15 }
 0x235   : > { %559 = vst [vmem:[#allocation2] sm:$0xff] %v557_v17 }
 0x236   : > { %560 = vst [vmem:[#allocation2 + $0x8] sm:$0xff] %v558_v18 }
 0x239   : > { %v564_v24 = vpop.permute.xlu1 %563 }
 0x23a   : > { %v565_v25 = vsel %vm296_vm0, %v562_v23, %v564_v24  ;;  %v566_v27 = vsel %vm296_vm0, %v564_v24, %v562_v23 }
 0x23b   : > { %v573_v28 = vmul.f32 %v569_v21, %v566_v27  ;;  %v574_v26 = vmul.f32 %v570_v22, %v565_v25 }
 0x23d   : > { %575 = vst [vmem:[#allocation2 + $0x10] sm:$0xff] %v573_v28  ;;  %v706_v29 = vpack.c.bf16 %v573_v28, %v557_v17  ;;  %v707_v30 = vpack.c.bf16 %v574_v26, %v558_v18 }
 0x23e   : > { %576 = vst [vmem:[#allocation2 + $0x18] sm:$0xff] %v574_v26 }
 0x23f   : > { %737 = vmatpush.bf16.msra.mxu2 %v706_v29  ;;  %750 = vmatpush.bf16.msra.mxu3 %v707_v30 }
 0x242   : > { %895 = vmatmul.msk.bf16.vlgmr.msra.gmra.mxu2 %vm716_vm14, %v685_v31  ;;  %896 = vmatmul.msk.bf16.vlgmr.msra.gmra.mxu3 %vm716_vm14, %v685_v31 }
 0x2c5   : > { %v739_v20 = vpop.f32.mrf.mxu2  ;;  %v752_v32 = vpop.f32.mrf.mxu3 }
 0x2c6   : > { %v756_v33 = vmax.f32 %v739_v20, 0.0  ;;  %v757_v34 = vmax.f32 %v752_v32, 0.0 }
 0x2c8   : > { %758 = vst [vmem:[%s259_s6] sm:$0xff] %v756_v33 }
 0x2c9   : > { %759 = vst [vmem:[%s259_s6 + $0x8] sm:$0xff] %v757_v34 }
 0x2ca   : > { %1138 = shalt.err (!%p1135_p11)
}
 0x2cb   : > { %918 = dma.vmem_to_hbm [thread:$0]  (%p1302_p7), %s775_s7, 256, %s777_s10, %s761_s21  }
 0x2cd   : > { %v741_v35 = vpop.f32.mrf.mxu2  ;;  %v754_v36 = vpop.f32.mrf.mxu3 }
 0x2ce PF: > { %s788_s5 = sand.u32 1, %s1177_s15   ;;  %p1527_p12 = scmp.ge.s32.totalorder %s1189_s18, 2 }
 0x2cf   : > { %s789_s20 = scalar_lea.sflag [#allocation5], %s788_s5 }
 0x2d0   : > { %p935_p13 = pnand %p1527_p12, %p1264_p6 }
 0x2d2   : > { %p936_p0 = pneg %p935_p13 }
 0x2d4   : > { %1172 = dma.done.wait (%p936_p0), %s789_s20, 256  }
 0x2d5   : > { %1174 = vsyncadd (%p936_p0), %s789_s20, 4294967040  ;;  %p19_p7 = scmp.ge.s32.totalorder %s1288_s13, 4   ;;  %s1528_s15 = smov %s1181_s16 }
 0x2d6   : > { %s1529_s16 = smov %s1185_s17  ;;  %s1530_s17 = smov %s1298_s23 }
 0x2d7   : > { %s1531_s18 = smov %s1288_s13  ;;  %21 = sbr.rel (!%p19_p7) target bundleno = 7 (0x7), region = 103 }
 0x2dc   :  { %795 = vsyncpa [#allocation4], 1 }
 0x2dd   :  { %797 = vsyncpa [#allocation4 + $0x1], 1 }
 0x2de   :  { %798 = vsyncpa [#allocation7], 1 }
 0x2df   :  { %800 = vsyncpa [#allocation7 + $0x1], 1 }
 0x2e0   :  { %801 = vsyncpa [#allocation10], 1 }
 0x2e1   :  { %802 = vsyncpa [#allocation5], 1 }
 0x2e2   :  { %804 = vsyncpa [#allocation5 + $0x1], 1 }

</bundles_post_ra>
